<compile_context>
chip_gen: v7x
topology: tpu7x:2x2x1
jax: 0.10.0
libtpu: 0.0.40
codegen_flags: <defaults>
</compile_context>

<pallas_src>
import functools

import jax
import jax.numpy as jnp
from jax.experimental import pallas as pl
from jax.experimental.pallas import tpu as pltpu

EPS = 1e-5
LANE = 128
SUBLANE = 8


def _round_up(n, m):
    return ((n + m - 1) // m) * m


def _pad2(a, rows, cols):
    # Zero padding only.  Padded BN columns stay exactly 0 because gamma/beta
    # are zero-padded (scale = 0 * rsqrt(0 + eps) = 0) and padded weight rows
    # are 0, so padded columns contribute nothing downstream.
    return jnp.pad(a, ((0, rows - a.shape[0]), (0, cols - a.shape[1])))


def _bn_relu_fused(h, gamma, beta):
    """Training-mode BatchNorm1d (biased batch stats) + ReLU in f32, with the
    affine fused into a single per-feature scale/shift:
        scale = gamma * rsqrt(var + eps)   # (1, F) row: EUP rsqrt + row mul
        y     = (h - mu) * scale + beta    # one full-tile mul + add
    """
    mu = jnp.mean(h, axis=0, keepdims=True)
    centered = h - mu
    var = jnp.mean(centered * centered, axis=0, keepdims=True)
    scale = gamma * jax.lax.rsqrt(var + EPS)
    return jnp.maximum(centered * scale + beta, 0.0)


def mlp_kernel(x_ref,
               w1_ref, g1_ref, be1_ref,
               w2_ref, g2_ref, be2_ref,
               w3_ref, b3_ref,
               o_ref):
    # MXU inputs in bf16; accumulation and all VPU math in f32.
    x = x_ref[...].astype(jnp.bfloat16)

    # layer1: Linear (bias dropped - cancels under training-mode BN) + BN + ReLU
    h1 = jnp.dot(x, w1_ref[...], preferred_element_type=jnp.float32)
    h1 = _bn_relu_fused(h1, g1_ref[...], be1_ref[...])

    # layer2: same structure
    h2 = jnp.dot(h1.astype(jnp.bfloat16), w2_ref[...],
                 preferred_element_type=jnp.float32)
    h2 = _bn_relu_fused(h2, g2_ref[...], be2_ref[...])

    # layer3: plain Linear (bias kept - no BN follows it)
    out = jnp.dot(h2.astype(jnp.bfloat16), w3_ref[...],
                  preferred_element_type=jnp.float32) + b3_ref[...]
    o_ref[...] = out.astype(o_ref.dtype)


def prepare_params(params):
    """One-time (hoisted) padding / layout / dtype prep of the parameters.
    Call once and reuse the result; only x is padded per forward call."""
    (w1, b1, g1, be1, w2, b2, g2, be2, w3, b3) = params
    del b1, b2  # cancel exactly under training-mode BatchNorm; never loaded

    in_dim, h1_dim = w1.shape
    h2_dim, out_dim = w2.shape[1], w3.shape[1]
    in_p, h1_p = _round_up(in_dim, LANE), _round_up(h1_dim, LANE)
    h2_p, out_p = _round_up(h2_dim, LANE), _round_up(out_dim, LANE)

    # Weights: zero-padded, bf16 for the MXU (halves weight HBM/VMEM traffic).
    w1p = _pad2(w1, in_p, h1_p).astype(jnp.bfloat16)
    w2p = _pad2(w2, h1_p, h2_p).astype(jnp.bfloat16)
    w3p = _pad2(w3, h2_p, out_p).astype(jnp.bfloat16)
    # BN affine + final bias stay f32 (VPU math is f32 on all generations).
    g1p, be1p = _pad2(g1, 1, h1_p), _pad2(be1, 1, h1_p)
    g2p, be2p = _pad2(g2, 1, h2_p), _pad2(be2, 1, h2_p)
    b3p = _pad2(b3, 1, out_p)
    return (w1p, g1p, be1p, w2p, g2p, be2p, w3p, b3p)


@functools.partial(jax.jit, static_argnames=("out_dim",))
def net_forward(x, prepared, out_dim):
    """Whole forward pass in one Pallas kernel (everything fits in VMEM at
    these shapes, so each BlockSpec is the full padded array).  The only
    per-call host-side ops are the x pad and the final slice, both compiled
    into this same jit."""
    (w1p, g1p, be1p, w2p, g2p, be2p, w3p, b3p) = prepared
    B, _ = x.shape
    in_p = w1p.shape[0]
    out_p = w3p.shape[1]

    # Batch stays on sublanes so BN's axis=0 reduce is a cheap sublane/XLU
    # reduction.  Zero-padded batch rows would corrupt the BN batch stats, so
    # we require B % 8 == 0 instead of padding rows.
    # TODO(synk): support ragged B by padding rows and masking the BN stats
    # (divide sums by the real row count and correct var for the padded rows).
    if B % SUBLANE != 0:
        raise ValueError(f"batch size {B} must be a multiple of {SUBLANE}")

    xp = _pad2(x, B, in_p)
    args = (xp, w1p, g1p, be1p, w2p, g2p, be2p, w3p, b3p)

    def full_block(a):
        # `a` is bound per call - no Python late-binding hazard.
        return pl.BlockSpec(a.shape, lambda: (0,) * a.ndim)

    out_padded = pl.pallas_call(
        mlp_kernel,
        out_shape=jax.ShapeDtypeStruct((B, out_p), jnp.float32),
        in_specs=[full_block(a) for a in args],
        out_specs=pl.BlockSpec((B, out_p), lambda: (0, 0)),
        # Toy shapes use <1 MiB; a 32 MiB scoped cap keeps the same code well
        # inside v7x's 64 MiB physical VMEM as well as v5e/v6e's 128 MiB.
        compiler_params=pltpu.CompilerParams(vmem_limit_bytes=32 * 1024 * 1024),
    )(*args)

    # TODO(synk): for large B / feature dims, switch to a batch-tiled grid
    # (weights VMEM-resident, batch axis "parallel" so v7x's 2 TensorCores
    # both work, K-reduction axis last and "arbitrary" with a pl.when-init'd
    # f32 accumulator) plus a two-pass BN; at toy sizes a single block is
    # optimal since each grid step costs ~0.35 us of pure overhead.
    return out_padded[:, :out_dim]


def init_params(key, in_dim, h1, h2, out_dim):
    """Deterministic init mimicking nn.Linear's uniform(-1/sqrt(fan_in), ...)
    and nn.BatchNorm1d's gamma=1 / beta=0."""
    ks = jax.random.split(key, 6)

    def linear(kw, kb, fan_in, fan_out):
        bound = 1.0 / jnp.sqrt(jnp.float32(fan_in))
        w = jax.random.uniform(kw, (fan_in, fan_out), jnp.float32, -bound, bound)
        b = jax.random.uniform(kb, (1, fan_out), jnp.float32, -bound, bound)
        return w, b

    w1, b1 = linear(ks[0], ks[1], in_dim, h1)
    w2, b2 = linear(ks[2], ks[3], h1, h2)
    w3, b3 = linear(ks[4], ks[5], h2, out_dim)
    g1, be1 = jnp.ones((1, h1), jnp.float32), jnp.zeros((1, h1), jnp.float32)
    g2, be2 = jnp.ones((1, h2), jnp.float32), jnp.zeros((1, h2), jnp.float32)
    return (w1, b1, g1, be1, w2, b2, g2, be2, w3, b3)


def reference_forward(x, params):
    """Pure-JAX f32 reference with PyTorch-equivalent semantics (biases
    included, unfused BN) for the semantics check."""
    (w1, b1, g1, be1, w2, b2, g2, be2, w3, b3) = params

    def bn_relu(h, gamma, beta):
        mu = jnp.mean(h, axis=0, keepdims=True)
        var = jnp.mean((h - mu) * (h - mu), axis=0, keepdims=True)
        y = (h - mu) * jax.lax.rsqrt(var + EPS) * gamma + beta
        return jnp.maximum(y, 0.0)

    h1 = bn_relu(x @ w1 + b1, g1, be1)
    h2 = bn_relu(h1 @ w2 + b2, g2, be2)
    return h2 @ w3 + b3


def reference_forward_matched(x, params):
    """Reference mirroring the kernel's arithmetic exactly (bf16 MXU inputs,
    f32 accumulation/BN, b1/b2 dropped, fused BN affine) for a tight check."""
    (w1, b1, g1, be1, w2, b2, g2, be2, w3, b3) = params
    del b1, b2

    def dot_bf16(a, w):
        return jnp.dot(a.astype(jnp.bfloat16), w.astype(jnp.bfloat16),
                       preferred_element_type=jnp.float32)

    h1 = _bn_relu_fused(dot_bf16(x, w1), g1, be1)
    h2 = _bn_relu_fused(dot_bf16(h1, w2), g2, be2)
    return dot_bf16(h2, w3) + b3


if __name__ == "__main__":
    # Small shapes consistent with Net(in_dim, n_hidden_1, n_hidden_2, out_dim)
    B, IN_DIM, H1, H2, OUT_DIM = 8, 32, 64, 32, 16

    key = jax.random.PRNGKey(0)
    kx, kp = jax.random.split(key)
    x = jax.random.normal(kx, (B, IN_DIM), jnp.float32)
    params = init_params(kp, IN_DIM, H1, H2, OUT_DIM)

    # Hoisted out of the hot path: pad / transpose / cast parameters once.
    prepared = prepare_params(params)

    out = net_forward(x, prepared, out_dim=OUT_DIM)
    out = jax.block_until_ready(out)
    assert out.shape == (B, OUT_DIM)

    # Tight check against the kernel-equivalent arithmetic.
    ref_matched = reference_forward_matched(x, params)
    assert jnp.allclose(out, ref_matched, atol=1e-3, rtol=1e-3)

    # Looser check against exact f32 PyTorch-semantics forward (bf16 MXU
    # inputs introduce ~1e-3 relative error).
    ref = reference_forward(x, params)
    assert jnp.allclose(out, ref, atol=3e-2, rtol=3e-2)

    print("KERNEL_OK")
</pallas_src>

<mosaic_0001>
module attributes {stable_mosaic.version = 11 : i64} {
  func.func @mlp_kernel(%arg0: memref<8x128xf32, #tpu.memory_space<vmem>>, %arg1: memref<128x128xbf16, #tpu.memory_space<vmem>>, %arg2: memref<1x128xf32, #tpu.memory_space<vmem>>, %arg3: memref<1x128xf32, #tpu.memory_space<vmem>>, %arg4: memref<128x128xbf16, #tpu.memory_space<vmem>>, %arg5: memref<1x128xf32, #tpu.memory_space<vmem>>, %arg6: memref<1x128xf32, #tpu.memory_space<vmem>>, %arg7: memref<128x128xbf16, #tpu.memory_space<vmem>>, %arg8: memref<1x128xf32, #tpu.memory_space<vmem>>, %arg9: memref<8x128xf32, #tpu.memory_space<vmem>>) attributes {dimension_semantics = [], scalar_prefetch = 0 : i64, scratch_operands = 0 : i64, tpu.core_type = #tpu.core_type<tc>} {
    %c0 = arith.constant 0 : index
    %c0_0 = arith.constant 0 : index
    %0 = vector.load %arg0[%c0, %c0_0] : memref<8x128xf32, #tpu.memory_space<vmem>>, vector<8x128xf32>
    %1 = arith.truncf %0 : vector<8x128xf32> to vector<8x128xbf16>
    %c0_1 = arith.constant 0 : index
    %c0_2 = arith.constant 0 : index
    %2 = vector.load %arg1[%c0_1, %c0_2] : memref<128x128xbf16, #tpu.memory_space<vmem>>, vector<128x128xbf16>
    %cst = arith.constant dense<0.000000e+00> : vector<8x128xf32>
    %3 = tpu.matmul %1, %2, %cst {dimension_numbers = #tpu.dot_dimension_numbers<[1], [0], [0], [1], [0, 0, 1, 1], [], []>} : vector<8x128xbf16>, vector<128x128xbf16>, vector<8x128xf32> -> vector<8x128xf32>
    %c0_3 = arith.constant 0 : index
    %c0_4 = arith.constant 0 : index
    %4 = vector.load %arg2[%c0_3, %c0_4] : memref<1x128xf32, #tpu.memory_space<vmem>>, vector<1x128xf32>
    %c0_5 = arith.constant 0 : index
    %c0_6 = arith.constant 0 : index
    %5 = vector.load %arg3[%c0_5, %c0_6] : memref<1x128xf32, #tpu.memory_space<vmem>>, vector<1x128xf32>
    %cst_7 = arith.constant dense<0.000000e+00> : vector<128xf32>
    %6 = vector.multi_reduction <add>, %3, %cst_7 [0] : vector<8x128xf32> to vector<128xf32>
    %7 = vector.shape_cast %6 : vector<128xf32> to vector<1x128xf32>
    %cst_8 = arith.constant 8.000000e+00 : f32
    %8 = vector.broadcast %cst_8 : f32 to vector<1x128xf32>
    %9 = arith.divf %7, %8 : vector<1x128xf32>
    %10 = vector.broadcast %9 : vector<1x128xf32> to vector<8x128xf32>
    %11 = arith.subf %3, %10 : vector<8x128xf32>
    %12 = arith.mulf %11, %11 : vector<8x128xf32>
    %cst_9 = arith.constant dense<0.000000e+00> : vector<128xf32>
    %13 = vector.multi_reduction <add>, %12, %cst_9 [0] : vector<8x128xf32> to vector<128xf32>
    %14 = vector.shape_cast %13 : vector<128xf32> to vector<1x128xf32>
    %cst_10 = arith.constant 8.000000e+00 : f32
    %15 = vector.broadcast %cst_10 : f32 to vector<1x128xf32>
    %16 = arith.divf %14, %15 : vector<1x128xf32>
    %cst_11 = arith.constant 9.99999974E-6 : f32
    %17 = vector.broadcast %cst_11 : f32 to vector<1x128xf32>
    %18 = arith.addf %16, %17 : vector<1x128xf32>
    %19 = math.rsqrt %18 : vector<1x128xf32>
    %20 = arith.mulf %4, %19 : vector<1x128xf32>
    %21 = vector.broadcast %20 : vector<1x128xf32> to vector<8x128xf32>
    %22 = arith.mulf %11, %21 : vector<8x128xf32>
    %23 = vector.broadcast %5 : vector<1x128xf32> to vector<8x128xf32>
    %24 = arith.addf %22, %23 : vector<8x128xf32>
    %cst_12 = arith.constant 0.000000e+00 : f32
    %25 = vector.broadcast %cst_12 : f32 to vector<8x128xf32>
    %26 = arith.maximumf %24, %25 : vector<8x128xf32>
    %27 = arith.truncf %26 : vector<8x128xf32> to vector<8x128xbf16>
    %c0_13 = arith.constant 0 : index
    %c0_14 = arith.constant 0 : index
    %28 = vector.load %arg4[%c0_13, %c0_14] : memref<128x128xbf16, #tpu.memory_space<vmem>>, vector<128x128xbf16>
    %cst_15 = arith.constant dense<0.000000e+00> : vector<8x128xf32>
    %29 = tpu.matmul %27, %28, %cst_15 {dimension_numbers = #tpu.dot_dimension_numbers<[1], [0], [0], [1], [0, 0, 1, 1], [], []>} : vector<8x128xbf16>, vector<128x128xbf16>, vector<8x128xf32> -> vector<8x128xf32>
    %c0_16 = arith.constant 0 : index
    %c0_17 = arith.constant 0 : index
    %30 = vector.load %arg5[%c0_16, %c0_17] : memref<1x128xf32, #tpu.memory_space<vmem>>, vector<1x128xf32>
    %c0_18 = arith.constant 0 : index
    %c0_19 = arith.constant 0 : index
    %31 = vector.load %arg6[%c0_18, %c0_19] : memref<1x128xf32, #tpu.memory_space<vmem>>, vector<1x128xf32>
    %cst_20 = arith.constant dense<0.000000e+00> : vector<128xf32>
    %32 = vector.multi_reduction <add>, %29, %cst_20 [0] : vector<8x128xf32> to vector<128xf32>
    %33 = vector.shape_cast %32 : vector<128xf32> to vector<1x128xf32>
    %cst_21 = arith.constant 8.000000e+00 : f32
    %34 = vector.broadcast %cst_21 : f32 to vector<1x128xf32>
    %35 = arith.divf %33, %34 : vector<1x128xf32>
    %36 = vector.broadcast %35 : vector<1x128xf32> to vector<8x128xf32>
    %37 = arith.subf %29, %36 : vector<8x128xf32>
    %38 = arith.mulf %37, %37 : vector<8x128xf32>
    %cst_22 = arith.constant dense<0.000000e+00> : vector<128xf32>
    %39 = vector.multi_reduction <add>, %38, %cst_22 [0] : vector<8x128xf32> to vector<128xf32>
    %40 = vector.shape_cast %39 : vector<128xf32> to vector<1x128xf32>
    %cst_23 = arith.constant 8.000000e+00 : f32
    %41 = vector.broadcast %cst_23 : f32 to vector<1x128xf32>
    %42 = arith.divf %40, %41 : vector<1x128xf32>
    %cst_24 = arith.constant 9.99999974E-6 : f32
    %43 = vector.broadcast %cst_24 : f32 to vector<1x128xf32>
    %44 = arith.addf %42, %43 : vector<1x128xf32>
    %45 = math.rsqrt %44 : vector<1x128xf32>
    %46 = arith.mulf %30, %45 : vector<1x128xf32>
    %47 = vector.broadcast %46 : vector<1x128xf32> to vector<8x128xf32>
    %48 = arith.mulf %37, %47 : vector<8x128xf32>
    %49 = vector.broadcast %31 : vector<1x128xf32> to vector<8x128xf32>
    %50 = arith.addf %48, %49 : vector<8x128xf32>
    %cst_25 = arith.constant 0.000000e+00 : f32
    %51 = vector.broadcast %cst_25 : f32 to vector<8x128xf32>
    %52 = arith.maximumf %50, %51 : vector<8x128xf32>
    %53 = arith.truncf %52 : vector<8x128xf32> to vector<8x128xbf16>
    %c0_26 = arith.constant 0 : index
    %c0_27 = arith.constant 0 : index
    %54 = vector.load %arg7[%c0_26, %c0_27] : memref<128x128xbf16, #tpu.memory_space<vmem>>, vector<128x128xbf16>
    %cst_28 = arith.constant dense<0.000000e+00> : vector<8x128xf32>
    %55 = tpu.matmul %53, %54, %cst_28 {dimension_numbers = #tpu.dot_dimension_numbers<[1], [0], [0], [1], [0, 0, 1, 1], [], []>} : vector<8x128xbf16>, vector<128x128xbf16>, vector<8x128xf32> -> vector<8x128xf32>
    %c0_29 = arith.constant 0 : index
    %c0_30 = arith.constant 0 : index
    %56 = vector.load %arg8[%c0_29, %c0_30] : memref<1x128xf32, #tpu.memory_space<vmem>>, vector<1x128xf32>
    %57 = vector.broadcast %56 : vector<1x128xf32> to vector<8x128xf32>
    %58 = arith.addf %55, %57 : vector<8x128xf32>
    %c0_31 = arith.constant 0 : index
    %c0_32 = arith.constant 0 : index
    %59 = vector.load %arg9[%c0_31, %c0_32] : memref<8x128xf32, #tpu.memory_space<vmem>>, vector<8x128xf32>
    tpu.vector_store %arg9[%c0_31, %c0_32], %58 {strides = array<i32>} : memref<8x128xf32, #tpu.memory_space<vmem>>, vector<8x128xf32>,
    return
  }
}

</mosaic_0001>

<bundles_post_ra>
// kernel: net_forward.1
= control target key start
LH: loop header
LB: loop body
LE: loop exit
PB: predicated region body
PF: predicated region fallthrough
CT: control target
= control target key end

     0   :  { %14 = vsyncpa [#allocation3], 0  ;;  %s902_s0 = inlined_call_operand.vmem [shape: f32[8,128], index: 0, kind: input, shape index: {}]   ;;  %s903_s1 = inlined_call_operand.hbm [shape: bf16[128,128], index: 1, kind: input, shape index: {}]   ;;  %s904_s2 = inlined_call_operand.vmem [shape: f32[1,128], index: 2, kind: input, shape index: {}]   ;;  %s905_s3 = inlined_call_operand.vmem [shape: f32[1,128], index: 3, kind: input, shape index: {}]   ;;  %s906_s4 = inlined_call_operand.hbm [shape: bf16[128,128], index: 4, kind: input, shape index: {}]   ;;  %s907_s5 = inlined_call_operand.vmem [shape: f32[1,128], index: 5, kind: input, shape index: {}]   ;;  %s908_s6 = inlined_call_operand.vmem [shape: f32[1,128], index: 6, kind: input, shape index: {}]   ;;  %s909_s7 = inlined_call_operand.hbm [shape: bf16[128,128], index: 7, kind: input, shape index: {}]   ;;  %s910_s8 = inlined_call_operand.vmem [shape: f32[1,128], index: 8, kind: input, shape index: {}]   ;;  %s911_s9 = inlined_call_operand.hbm [shape: f32[8,128], index: 9, kind: output, shape index: {}]  }
   0x1   :  { %15 = vsyncpa [#allocation6], 0 }
   0x2   :  { %16 = vsyncpa [#allocation4], 0  ;;  %s732_s30 = smov [#allocation5]   ;;  %s733_s11 = smov [#allocation2]  }
   0x3   :  { %s40_s10 = sshll.u32 %s732_s30, 4  ;;  %s24_s12 = sshll.u32 %s733_s11, 4  ;;  %s41_s10 = int_to_ptr.vmem [resolvable:$true] %s40_s10  ;;  %s790_s12 = int_to_ptr.vmem [resolvable:$true] %s24_s12 }
   0x4   :  { %s638_s15 = scalar_lea.hbm %s906_s4, 1024 }
   0x5   :  { %p639_p0 = scmp.ne.s32.totalorder %s906_s4, %s638_s15  ;;  %p642_p1 = scmp.lt.u32.totalorder %s638_s15, %s906_s4 }
   0x7   :  { %p644_p2 = pnand %p642_p1, %p639_p0 }
   0x9   :  { %647 = shalt.err (!%p644_p2)
}
   0xa   :  { %s648_s20 = scalar_lea.vmem %s41_s10, 1024  ;;  %p653_p4 = scmp.lt.s32.totalorder %s41_s10, %s41_s10 }
   0xb   :  { %p649_p3 = scmp.ne.s32.totalorder %s41_s10, %s648_s20  ;;  %p654_p5 = scmp.lt.s32.totalorder %s648_s20, %s648_s20 }
   0xd   :  { %p655_p6 = por %p654_p5, %p653_p4 }
   0xf   :  { %p656_p7 = pnand %p655_p6, %p649_p3 }
  0x11   :  { %659 = shalt.err (!%p656_p7)
}
  0x12   :  { %s734_s21 = smov 64   ;;  %s735_s22 = smov 4  }
  0x13   :  { %46 = dma.hbm_to_vmem [thread:$0]  %s906_s4, 1024, %s41_s10, [#allocation6], %s734_s21, %s734_s21, %s735_s22  }
  0x14   :  { %s660_s27 = scalar_lea.hbm %s903_s1, 1024 }
  0x15   :  { %p661_p8 = scmp.ne.s32.totalorder %s903_s1, %s660_s27  ;;  %p664_p9 = scmp.lt.u32.totalorder %s660_s27, %s903_s1 }
  0x17   :  { %p666_p10 = pnand %p664_p9, %p661_p8 }
  0x19   :  { %669 = shalt.err (!%p666_p10)
}
  0x1a   :  { %s670_s13 = scalar_lea.vmem %s790_s12, 1024  ;;  %p675_p12 = scmp.lt.s32.totalorder %s790_s12, %s790_s12 }
  0x1b   :  { %p671_p11 = scmp.ne.s32.totalorder %s790_s12, %s670_s13  ;;  %p676_p13 = scmp.lt.s32.totalorder %s670_s13, %s670_s13 }
  0x1d   :  { %p677_p0 = por %p676_p13, %p675_p12 }
  0x1f   :  { %p678_p1 = pnand %p677_p0, %p671_p11 }
  0x21   :  { %681 = shalt.err (!%p678_p1)
}
  0x22   :  { %30 = dma.hbm_to_vmem [thread:$0]  %s903_s1, 1024, %s790_s12, [#allocation3], %s734_s21, %s734_s21, %s735_s22  }
  0x23   :  { %s736_s14 = smov [#allocation7]   ;;  %s682_s18 = scalar_lea.hbm %s909_s7, 1024 }
  0x24   :  { %s56_s15 = sshll.u32 %s736_s14, 4  ;;  %p683_p2 = scmp.ne.s32.totalorder %s909_s7, %s682_s18  ;;  %s57_s15 = int_to_ptr.vmem [resolvable:$true] %s56_s15 }
  0x25   :  { %p686_p3 = scmp.lt.u32.totalorder %s682_s18, %s909_s7 }
  0x27   :  { %p688_p4 = pnand %p686_p3, %p683_p2 }
  0x29   :  { %691 = shalt.err (!%p688_p4)
}
  0x2a   :  { %s692_s25 = scalar_lea.vmem %s57_s15, 1024  ;;  %p697_p6 = scmp.lt.s32.totalorder %s57_s15, %s57_s15 }
  0x2b   :  { %p693_p5 = scmp.ne.s32.totalorder %s57_s15, %s692_s25  ;;  %p698_p7 = scmp.lt.s32.totalorder %s692_s25, %s692_s25 }
  0x2d   :  { %p699_p8 = por %p698_p7, %p697_p6 }
  0x2f   :  { %p700_p9 = pnand %p699_p8, %p693_p5 }
  0x31   :  { %703 = shalt.err (!%p700_p9)
}
  0x32   :  { %62 = dma.hbm_to_vmem [thread:$0]  %s909_s7, 1024, %s57_s15, [#allocation6], %s734_s21, %s734_s21, %s735_s22  }
  0x33   :  { %726 = dma.done.wait [#allocation3], 1024  }
  0x34   :  { %727 = vsyncadd [#allocation3], 4294966272 }
  0x35   :  { %728 = dma.done.wait [#allocation6], 2048  }
  0x36   :  { %729 = vsyncadd [#allocation6], 4294965248  ;;  %v737_v0 = vmov 0.0   ;;  %vm738_vm0 = vmmov 0   ;;  %v610_v1 = vld [vmem:[#allocation2] sm:$0xff]   ;;  %v611_v2 = vld [vmem:[#allocation2 + $0x8] sm:$0xff]   ;;  %v204_v40 = vlaneseq }
  0x37   :  { %542 = vmatprep.subr.bf16.mxu0 %v737_v0  ;;  %558 = vmatprep.mubr.msk.bf16.mxu0 %vm738_vm0, %v737_v0  ;;  %v612_v3 = vld [vmem:[#allocation2 + $0x10] sm:$0xff]   ;;  %v613_v4 = vld [vmem:[#allocation2 + $0x18] sm:$0xff]   ;;  %v614_v5 = vld [vmem:[#allocation2 + $0x20] sm:$0xff]   ;;  %s739_s13 = smov [#allocation8]  }
  0x38   :  { %562 = vmatprep.subr.bf16.mxu1 %v737_v0  ;;  %578 = vmatprep.mubr.msk.bf16.mxu1 %vm738_vm0, %v737_v0  ;;  %v615_v6 = vld [vmem:[#allocation2 + $0x28] sm:$0xff]   ;;  %v616_v7 = vld [vmem:[#allocation2 + $0x30] sm:$0xff]   ;;  %v617_v8 = vld [vmem:[#allocation2 + $0x38] sm:$0xff]   ;;  %v205_v41 = vshrl.u32 %v204_v40, 7  ;;  %s478_s4 = sshll.u32 %s739_s13, 4  ;;  %s479_s4 = int_to_ptr.vmem [resolvable:$true] %s478_s4 }
  0x39   :  { %543 = vmatpush3.bf16.msra.mxu0 %v610_v1  ;;  %v75_v9 = vld [vmem:[%s902_s0] sm:$0xff]  ;;  %v619_v12 = vld [vmem:[#allocation5 + $0x8] sm:$0xff]   ;;  %v620_v13 = vld [vmem:[#allocation5 + $0x10] sm:$0xff]   ;;  %p709_p11 = scmp.lt.s32.totalorder %s479_s4, %s479_s4 }
  0x3a   :  { %544 = vmatprep.subr.bf16.mxu0 %v737_v0  ;;  %v76_v10 = vpack.c.bf16 %v75_v9, %v75_v9  ;;  %v618_v11 = vld [vmem:[#allocation5] sm:$0xff]   ;;  %v621_v14 = vld [vmem:[#allocation5 + $0x18] sm:$0xff]   ;;  %v623_v16 = vld [vmem:[#allocation5 + $0x28] sm:$0xff]   ;;  %v206_v43 = vsub.s32 0, %v205_v41 }
  0x3b   :  { %563 = vmatpush3.bf16.msra.mxu1 %v618_v11  ;;  %v622_v15 = vld [vmem:[#allocation5 + $0x20] sm:$0xff]   ;;  %v624_v17 = vld [vmem:[#allocation5 + $0x30] sm:$0xff]   ;;  %v625_v18 = vld [vmem:[#allocation5 + $0x38] sm:$0xff]  }
  0x3c   :  { %564 = vmatprep.subr.bf16.mxu1 %v737_v0  ;;  %v181_v42 = vld [vmem:[%s904_s2] sm:$0x1]  ;;  %v627_v53 = vld [vmem:[#allocation7 + $0x8] sm:$0xff]   ;;  %v628_v54 = vld [vmem:[#allocation7 + $0x10] sm:$0xff]  }
  0x3d   :  { %545 = vmatpush3.bf16.msra.mxu0 %v611_v2  ;;  %v496_v47 = vld [vmem:[%s905_s3] ss:$0 sm:$0xff]  ;;  %v629_v55 = vld [vmem:[#allocation7 + $0x18] sm:$0xff]   ;;  %v631_v57 = vld [vmem:[#allocation7 + $0x28] sm:$0xff]  }
  0x3e   :  { %546 = vmatprep.subr.bf16.mxu0 %v737_v0  ;;  %v626_v52 = vld [vmem:[#allocation7] sm:$0xff]   ;;  %v632_v58 = vld [vmem:[#allocation7 + $0x30] sm:$0xff]   ;;  %v633_v59 = vld [vmem:[#allocation7 + $0x38] sm:$0xff]  }
  0x3f   :  { %565 = vmatpush3.bf16.msra.mxu1 %v619_v12  ;;  %v630_v56 = vld [vmem:[#allocation7 + $0x20] sm:$0xff]  }
  0x40   :  { %566 = vmatprep.subr.bf16.mxu1 %v737_v0 }
  0x41   :  { %547 = vmatpush3.bf16.msra.mxu0 %v612_v3 }
  0x42   :  { %548 = vmatprep.subr.bf16.mxu0 %v737_v0 }
  0x43   :  { %567 = vmatpush3.bf16.msra.mxu1 %v620_v13 }
  0x44   :  { %568 = vmatprep.subr.bf16.mxu1 %v737_v0 }
  0x45   :  { %549 = vmatpush3.bf16.msra.mxu0 %v613_v4 }
  0x46   :  { %550 = vmatprep.subr.bf16.mxu0 %v737_v0 }
  0x47   :  { %569 = vmatpush3.bf16.msra.mxu1 %v621_v14 }
  0x48   :  { %570 = vmatprep.subr.bf16.mxu1 %v737_v0 }
  0x49   :  { %551 = vmatpush3.bf16.msra.mxu0 %v614_v5 }
  0x4a   :  { %552 = vmatprep.subr.bf16.mxu0 %v737_v0 }
  0x4b   :  { %571 = vmatpush3.bf16.msra.mxu1 %v622_v15 }
  0x4c   :  { %572 = vmatprep.subr.bf16.mxu1 %v737_v0 }
  0x4d   :  { %553 = vmatpush3.bf16.msra.mxu0 %v615_v6 }
  0x4e   :  { %554 = vmatprep.subr.bf16.mxu0 %v737_v0 }
  0x4f   :  { %573 = vmatpush3.bf16.msra.mxu1 %v623_v16 }
  0x50   :  { %574 = vmatprep.subr.bf16.mxu1 %v737_v0 }
  0x51   :  { %555 = vmatpush3.bf16.msra.mxu0 %v616_v7 }
  0x52   :  { %556 = vmatprep.subr.bf16.mxu0 %v737_v0 }
  0x53   :  { %575 = vmatpush3.bf16.msra.mxu1 %v624_v17  ;;  %v323_v17 = vld [vmem:[%s907_s5] sm:$0x1]  ;;  %s704_s5 = scalar_lea.vmem %s479_s4, 128 }
  0x54   :  { %576 = vmatprep.subr.bf16.mxu1 %v737_v0  ;;  %p705_p10 = scmp.ne.s32.totalorder %s479_s4, %s704_s5  ;;  %p710_p12 = scmp.lt.s32.totalorder %s704_s5, %s704_s5 }
  0x55   :  { %557 = vmatpush3.bf16.msra.mxu0 %v617_v8 }
  0x56   :  { %582 = vmatprep.subr.bf16.mxu0 %v737_v0  ;;  %p711_p13 = por %p710_p12, %p709_p11 }
  0x57   :  { %577 = vmatpush3.bf16.msra.mxu1 %v625_v18 }
  0x58   :  { %559 = vmatmul.mubr.bf16.vlgmr.msra.gmra.mrb[0].mxu0 %v76_v10  ;;  %p712_p0 = pnand %p711_p13, %p705_p10 }
  0x59   :  { %598 = vmatprep.mubr.msk.bf16.mxu0 %vm738_vm0, %v737_v0  ;;  %583 = vmatpush3.bf16.msra.mxu0 %v626_v52 }
  0x5a   :  { %584 = vmatprep.subr.bf16.mxu0 %v737_v0 }
  0x5d   :  { %585 = vmatpush3.bf16.msra.mxu0 %v627_v53 }
  0x5e   :  { %586 = vmatprep.subr.bf16.mxu0 %v737_v0 }
  0x61   :  { %587 = vmatpush3.bf16.msra.mxu0 %v628_v54 }
  0x62   :  { %588 = vmatprep.subr.bf16.mxu0 %v737_v0 }
  0x65   :  { %589 = vmatpush3.bf16.msra.mxu0 %v629_v55 }
  0x66   :  { %590 = vmatprep.subr.bf16.mxu0 %v737_v0 }
  0x69   :  { %591 = vmatpush3.bf16.msra.mxu0 %v630_v56 }
  0x6a   :  { %592 = vmatprep.subr.bf16.mxu0 %v737_v0 }
  0x6d   :  { %593 = vmatpush3.bf16.msra.mxu0 %v631_v57 }
  0x6e   :  { %594 = vmatprep.subr.bf16.mxu0 %v737_v0 }
  0x71   :  { %595 = vmatpush3.bf16.msra.mxu0 %v632_v58 }
  0x72   :  { %596 = vmatprep.subr.bf16.mxu0 %v737_v0 }
  0x75   :  { %597 = vmatpush3.bf16.msra.mxu0 %v633_v59 }
 0x12b   :  { %v175_v19 = vpop.f32.mrb[0].mxu0 }
 0x12c   :  { %v183_v20 = vrot.slane %v175_v19, 4  ;;  %v560_v21 = vpop.f32.mrb[1].mxu0 }
 0x12d   :  { %v178_v22 = vpop.f32.mrb[2].mxu0  ;;  %v505_v21 = vld [vmem:[%s908_s6] ss:$0 sm:$0xff] }
 0x12e   :  { %v184_v23 = vadd.f32 %v183_v20, %v175_v19  ;;  %v561_v24 = vpop.f32.mrb[3].mxu0 }
 0x130   :  { %v185_v25 = vrot.slane %v184_v23, 2 }
 0x132   :  { %v186_v26 = vadd.f32 %v185_v25, %v184_v23 }
 0x134   :  { %v187_v27 = vrot.slane %v186_v26, 1 }
 0x136   :  { %v188_v28 = vadd.f32 %v187_v27, %v186_v26  ;;  %v506_v26 = vld [vmem:[%s910_s8] ss:$0 sm:$0xff] }
 0x138   :  { %v190_v29 = vmul.f32 0.125, %v188_v28 }
 0x13a   :  { %v191_v30 = vsub.f32 %v175_v19, %v190_v29 }
 0x13c   :  { %v192_v31 = vmul.f32 %v191_v30, %v191_v30 }
 0x13e   :  { %v193_v32 = vrot.slane %v192_v31, 4 }
 0x140   :  { %v194_v33 = vadd.f32 %v193_v32, %v192_v31 }
 0x142   :  { %v195_v34 = vrot.slane %v194_v33, 2 }
 0x144   :  { %v196_v35 = vadd.f32 %v195_v34, %v194_v33 }
 0x146   :  { %v197_v36 = vrot.slane %v196_v35, 1 }
 0x148   :  { %v198_v37 = vadd.f32 %v197_v36, %v196_v35 }
 0x14a   :  { %v199_v38 = vmul.f32 0.125, %v198_v37 }
 0x14c   :  { %v200_v39 = vadd.f32 1e-05, %v199_v38 }
 0x14e   :  { %634 = vrsqrt.f32 %v200_v39 }
 0x158   :  { %v635_v44 = vpop.eup %634 }
 0x159   :  { %v202_v45 = vmul.f32 %v635_v44, %v181_v42 }
 0x15b   :  { %v207_v46 = vrot.slane %v202_v45, %v206_v43 }
 0x15d   :  { %v209_v48 = vmul.f32 %v207_v46, %v191_v30 }
 0x15f   :  { %v216_v49 = vadd.f32 %v496_v47, %v209_v48 }
 0x161   :  { %v217_v50 = vmax.f32 %v216_v49, 0.0 }
 0x163   :  { %v218_v51 = vpack.c.bf16 %v217_v50, %v217_v50 }
 0x165   :  { %579 = vmatmul.mubr.bf16.vlgmr.msra.gmra.mrb[0].mxu1 %v218_v51 }
 0x238   :  { %v317_v60 = vpop.f32.mrb[0].mxu1 }
 0x239   :  { %v325_v61 = vrot.slane %v317_v60, 4  ;;  %v580_v62 = vpop.f32.mrb[1].mxu1 }
 0x23a   :  { %v320_v63 = vpop.f32.mrb[2].mxu1 }
 0x23b   :  { %v326_v1 = vadd.f32 %v325_v61, %v317_v60  ;;  %v581_v2 = vpop.f32.mrb[3].mxu1 }
 0x23d   :  { %v327_v3 = vrot.slane %v326_v1, 2 }
 0x23f   :  { %v328_v4 = vadd.f32 %v327_v3, %v326_v1 }
 0x241   :  { %v329_v5 = vrot.slane %v328_v4, 1 }
 0x243   :  { %v330_v6 = vadd.f32 %v329_v5, %v328_v4 }
 0x245   :  { %v331_v7 = vmul.f32 0.125, %v330_v6 }
 0x247   :  { %v332_v8 = vsub.f32 %v317_v60, %v331_v7 }
 0x249   :  { %v333_v9 = vmul.f32 %v332_v8, %v332_v8 }
 0x24b   :  { %v334_v10 = vrot.slane %v333_v9, 4 }
 0x24d   :  { %v335_v11 = vadd.f32 %v334_v10, %v333_v9 }
 0x24f   :  { %v336_v12 = vrot.slane %v335_v11, 2 }
 0x251   :  { %v337_v13 = vadd.f32 %v336_v12, %v335_v11 }
 0x253   :  { %v338_v0 = vrot.slane %v337_v13, 1 }
 0x255   :  { %v339_v14 = vadd.f32 %v338_v0, %v337_v13 }
 0x257   :  { %v340_v15 = vmul.f32 0.125, %v339_v14 }
 0x259   :  { %v341_v16 = vadd.f32 1e-05, %v340_v15 }
 0x25b   :  { %636 = vrsqrt.f32 %v341_v16 }
 0x265   :  { %v637_v18 = vpop.eup %636 }
 0x266   :  { %v343_v19 = vmul.f32 %v637_v18, %v323_v17 }
 0x268   :  { %v348_v20 = vrot.slane %v343_v19, %v206_v43 }
 0x26a   :  { %v350_v22 = vmul.f32 %v348_v20, %v332_v8 }
 0x26c   :  { %v357_v23 = vadd.f32 %v505_v21, %v350_v22 }
 0x26e   :  { %v358_v24 = vmax.f32 %v357_v23, 0.0 }
 0x270   :  { %v359_v25 = vpack.c.bf16 %v358_v24, %v358_v24 }
 0x272   :  { %599 = vmatmul.mubr.bf16.vlgmr.msra.gmra.mrb[4].mxu0 %v359_v25 }
 0x345   :  { %v465_v27 = vpop.f32.mrb[4].mxu0 }
 0x346   :  { %v466_v28 = vadd.f32 %v506_v26, %v465_v27  ;;  %v600_v29 = vpop.f32.mrb[5].mxu0 }
 0x347   :  { %v468_v30 = vpop.f32.mrb[6].mxu0 }
 0x348   :  { %471 = vst [vmem:[#allocation8] sm:$0xff] %v466_v28  ;;  %v601_v31 = vpop.f32.mrb[7].mxu0 }
 0x349   :  { %715 = shalt.err (!%p712_p0)
}
 0x34a   :  { %s716_s8 = scalar_lea.hbm %s911_s9, 128 }
 0x34b   :  { %p717_p1 = scmp.ne.s32.totalorder %s911_s9, %s716_s8  ;;  %p720_p2 = scmp.lt.u32.totalorder %s716_s8, %s911_s9 }
 0x34d   :  { %p722_p3 = pnand %p720_p2, %p717_p1 }
 0x34f   :  { %725 = shalt.err (!%p722_p3)
}
 0x350   :  { %481 = dma.vmem_to_hbm [thread:$0]  %s479_s4, 128, %s911_s9, [#allocation4]  }
 0x351   :  { %730 = dma.done.wait [#allocation4], 128  }
 0x352   :  { %731 = vsyncadd [#allocation4], 4294967168 }
 0x353   :  { %485 = vsyncpa [#allocation3], 1 }
 0x354   :  { %486 = vsyncpa [#allocation6], 1 }
 0x355   :  { %487 = vsyncpa [#allocation4], 1 }

</bundles_post_ra>
